<compile_context>
chip_gen: v7x
topology: tpu7x:2x2x1
jax: 0.10.0
libtpu: 0.0.40
codegen_flags: <defaults>
</compile_context>

<pallas_src>
import functools

import jax
import jax.numpy as jnp
from jax import lax
from jax.experimental import pallas as pl
from jax.experimental.pallas import tpu as pltpu


def _mase_partials_kernel(*refs, rows_total, tb, m_offset, has_pe_weight, needs_mask):
    """Per-tile partial sums of the (weighted) prediction / seasonal-naive errors.

    Ref layout (depends on has_pe_weight):
        y_ref, yp_ref, wnv_ref[, wpe_ref], pe_out_ref, nv_out_ref
    Each output block is an (8, 128) slab broadcast-filled with the tile's partial sum
    (single unmasked lane-dense store); the wrapper reads element [0, 0] per tile and
    finishes the reduction.  No carried state => the grid axis is fully parallel.
    """
    if has_pe_weight:
        y_ref, yp_ref, wnv_ref, wpe_ref, pe_out_ref, nv_out_ref = refs
    else:
        y_ref, yp_ref, wnv_ref, pe_out_ref, nv_out_ref = refs
        wpe_ref = None

    y = y_ref[...].astype(jnp.float32)      # cast on the streamed tile, not in the wrapper
    yp = yp_ref[...].astype(jnp.float32)

    # --- prediction errors: |y - y_pred| (optionally per-observable weighted) ----------
    pe = jnp.abs(y - yp)
    if has_pe_weight:
        pe = pe * wpe_ref[...]

    # --- seasonal-naive errors ---------------------------------------------------------
    # Each row is one contiguous (T, D) sequence, so y[t] vs y[t-m] is a column shift by
    # m*D.  A whole-tile lane rotation (XLU slot, stays vreg aligned) replaces the two
    # lane-misaligned slices; w_nv zeroes the wrapped m*D columns and folds in the
    # stride-m time selection and the optional per-observable weights.
    y_shift = pltpu.roll(y, shift=m_offset, axis=1)
    nv = jnp.abs(y - y_shift) * wnv_ref[...]

    if needs_mask:
        # Ragged final tile: mask AFTER the per-row reduction (one select per row, not
        # per element).  Select never propagates values from the unchosen branch, so
        # unspecified out-of-bounds block data (possibly NaN/inf) cannot poison the sums.
        i = pl.program_id(0)
        row_ids = lax.broadcasted_iota(jnp.int32, (tb, 1), 0)
        valid = row_ids < (rows_total - i * tb)
        pe_part = jnp.sum(jnp.where(valid, jnp.sum(pe, axis=1, keepdims=True), 0.0))
        nv_part = jnp.sum(jnp.where(valid, jnp.sum(nv, axis=1, keepdims=True), 0.0))
    else:
        pe_part = jnp.sum(pe)
        nv_part = jnp.sum(nv)

    pe_out_ref[...] = jnp.broadcast_to(pe_part, pe_out_ref.shape)
    nv_out_ref[...] = jnp.broadcast_to(nv_part, nv_out_ref.shape)


def mase_loss(y, y_pred, *, m: int = 1, eps: float = 1e-8,
              accountable_observables=None, target_block_bytes: int = 4 << 20):
    """Mean Absolute Scaled Error, matching MASELossModule.forward."""
    assert y.shape == y_pred.shape
    assert y.ndim >= 2, "MASE expects inputs shaped [..., time, observables]"
    T, D = y.shape[-2], y.shape[-1]
    assert T > m, "need more than m timesteps for the seasonal-naive baseline"

    B = 1
    for s in y.shape[:-2]:
        B *= s
    L = T * D
    n_sel = len(range(m, T, m))             # naive differences per sequence

    # --- weight rows (computed once, tiny) ----------------------------------------------
    has_pe_weight = accountable_observables is not None
    if has_pe_weight:
        w_obs = jnp.asarray(accountable_observables, jnp.float32).reshape(D)
    else:
        w_obs = jnp.ones((D,), jnp.float32)
    t_idx = jnp.arange(T, dtype=jnp.int32)
    sel_t = ((t_idx >= m) & (t_idx % m == 0)).astype(jnp.float32)   # stride-m time picks
    # Full-width naive weight row: zero on the m*D columns wrapped by the roll (t < m),
    # zero on non-multiples of m, w_obs[d] elsewhere.
    w_nv = (sel_t[:, None] * w_obs[None, :]).reshape(1, L)
    w_pe = jnp.tile(w_obs, T).reshape(1, L) if has_pe_weight else None

    # --- free, lane-dense re-layout: (B, T*D).  No padding / no extra HBM passes. -------
    y2 = y.reshape(B, L)
    yp2 = y_pred.reshape(B, L)

    # --- dtype-aware row-tile sizing against an explicit VMEM budget --------------------
    itemsize = jnp.dtype(y.dtype).itemsize
    bytes_per_row = L * itemsize
    sub = 8 * max(1, 4 // itemsize)                 # 8 rows (f32), 16 (bf16), 32 (int8)
    vmem_request_cap = 40 << 20                     # total scoped VMEM we will ask for
    per_block_budget = (vmem_request_cap - (4 << 20)) // 4   # 2 inputs x 2 buffers
    block_cap = min(target_block_bytes, per_block_budget)
    tb = (block_cap // max(bytes_per_row, 1)) // sub * sub
    tb = max(sub, min(tb, 4096))
    if tb >= B:
        tb = B                                      # full extent — always a legal block
    num_tiles = pl.cdiv(B, tb)
    needs_mask = (B % tb) != 0
    block_bytes = tb * bytes_per_row
    vmem_limit = int(min(64 << 20, max(16 << 20, 4 * block_bytes + (4 << 20))))

    kernel = functools.partial(
        _mase_partials_kernel, rows_total=B, tb=tb, m_offset=m * D,
        has_pe_weight=has_pe_weight, needs_mask=needs_mask)

    in_specs = [
        pl.BlockSpec((tb, L), lambda i: (i, 0)),
        pl.BlockSpec((tb, L), lambda i: (i, 0)),
        pl.BlockSpec((1, L), lambda i: (0, 0)),     # resident naive-weight row
    ]
    inputs = [y2, yp2, w_nv]
    if has_pe_weight:
        in_specs.append(pl.BlockSpec((1, L), lambda i: (0, 0)))
        inputs.append(w_pe)

    out_shape = (jax.ShapeDtypeStruct((num_tiles * 8, 128), jnp.float32),
                 jax.ShapeDtypeStruct((num_tiles * 8, 128), jnp.float32))
    out_specs = (pl.BlockSpec((8, 128), lambda i: (i, 0)),
                 pl.BlockSpec((8, 128), lambda i: (i, 0)))

    in_bytes = 2 * B * L * itemsize + (2 if has_pe_weight else 1) * L * 4
    out_bytes = 2 * num_tiles * 8 * 128 * 4
    cost = pl.CostEstimate(flops=8 * B * L, transcendentals=0,
                           bytes_accessed=in_bytes + out_bytes)

    pe_tiles, nv_tiles = pl.pallas_call(
        kernel,
        out_shape=out_shape,
        grid=(num_tiles,),
        in_specs=in_specs,
        out_specs=out_specs,
        compiler_params=pltpu.CompilerParams(
            dimension_semantics=("parallel",),
            vmem_limit_bytes=vmem_limit),
        cost_estimate=cost,
    )(*inputs)

    # --- tiny scalar epilogue (matches torch: plain means, exact ==0 -> eps) ------------
    pe_sum = jnp.sum(pe_tiles.reshape(num_tiles, 8, 128)[:, 0, 0])
    nv_sum = jnp.sum(nv_tiles.reshape(num_tiles, 8, 128)[:, 0, 0])
    pred_mean = pe_sum / jnp.float32(B * T * D)
    naive_mean = nv_sum / jnp.float32(B * n_sel * D)
    naive_mean = jnp.where(naive_mean == 0.0, jnp.float32(eps), naive_mean)
    return pred_mean / naive_mean


def _reference(y, y_pred, m=1, eps=1e-8, accountable_observables=None):
    y = y.astype(jnp.float32)
    y_pred = y_pred.astype(jnp.float32)
    naive = jnp.abs(y[..., m::m, :] - y[..., :-m:m, :])
    pred_err = jnp.abs(y - y_pred)
    if accountable_observables is not None:
        w = jnp.asarray(accountable_observables, jnp.float32)
        naive = naive * w
        pred_err = pred_err * w
    naive_mean = jnp.mean(naive)
    naive_mean = jnp.where(naive_mean == 0.0, jnp.float32(eps), naive_mean)
    return jnp.mean(pred_err) / naive_mean


if __name__ == "__main__":
    key = jax.random.PRNGKey(0)
    k1, k2 = jax.random.split(key)

    # (batch=2, channels=4, time=16, observables=32) — 4-D, as implied by the
    # [None, None, None, :] broadcast of accountable_observables in the module.
    shape = (2, 4, 16, 32)
    y = jax.random.normal(k1, shape, jnp.float32)
    y_pred = y + 0.1 * jax.random.normal(k2, shape, jnp.float32)

    # Default module config: m=1, eps=1e-8, no observable weights.
    loss = jax.block_until_ready(mase_loss(y, y_pred))
    ref = _reference(y, y_pred)
    if not jnp.allclose(loss, ref, rtol=1e-5, atol=1e-6):
        raise AssertionError(f"default path mismatch: pallas={loss} ref={ref}")

    # Weighted, seasonal (m=2) config on a shape that also exercises the ragged-tile
    # mask path (B=15 rows, forced 8-row tiles via a tiny block-byte target).
    shape2 = (3, 5, 16, 32)
    k3, k4 = jax.random.split(k2)
    y2 = jax.random.normal(k3, shape2, jnp.float32)
    yp2 = y2 + 0.05 * jax.random.normal(k4, shape2, jnp.float32)
    obs = [1 if (i % 3 != 0) else 0 for i in range(shape2[-1])]
    loss2 = jax.block_until_ready(
        mase_loss(y2, yp2, m=2, accountable_observables=obs, target_block_bytes=1))
    ref2 = _reference(y2, yp2, m=2, accountable_observables=obs)
    if not jnp.allclose(loss2, ref2, rtol=1e-5, atol=1e-6):
        raise AssertionError(f"weighted/m=2 path mismatch: pallas={loss2} ref={ref2}")

    print("KERNEL_OK")
</pallas_src>

<mosaic_0001>
module attributes {stable_mosaic.version = 11 : i64} {
  func.func @_mase_partials_kernel(%arg0: i32, %arg1: memref<8x512xf32, #tpu.memory_space<vmem>>, %arg2: memref<8x512xf32, #tpu.memory_space<vmem>>, %arg3: memref<1x512xf32, #tpu.memory_space<vmem>>, %arg4: memref<8x128xf32, #tpu.memory_space<vmem>>, %arg5: memref<8x128xf32, #tpu.memory_space<vmem>>) attributes {dimension_semantics = [#tpu.dimension_semantics<parallel>], iteration_bounds = array<i64: 1>, scalar_prefetch = 0 : i64, scratch_operands = 0 : i64, tpu.core_type = #tpu.core_type<tc>, window_params = [{transform_indices = @transform_0, window_bounds = array<i64: 8, 512>}, {transform_indices = @transform_1, window_bounds = array<i64: 8, 512>}, {pipeline_mode = #tpu.pipeline_mode<synchronous>, transform_indices = @transform_2, window_bounds = array<i64: 1, 512>}, {transform_indices = @transform_3, window_bounds = array<i64: 8, 128>}, {transform_indices = @transform_4, window_bounds = array<i64: 8, 128>}]} {
    %c0 = arith.constant 0 : index
    %c0_0 = arith.constant 0 : index
    %0 = vector.load %arg1[%c0, %c0_0] : memref<8x512xf32, #tpu.memory_space<vmem>>, vector<8x512xf32>
    %c0_1 = arith.constant 0 : index
    %c0_2 = arith.constant 0 : index
    %1 = vector.load %arg2[%c0_1, %c0_2] : memref<8x512xf32, #tpu.memory_space<vmem>>, vector<8x512xf32>
    %2 = arith.subf %0, %1 : vector<8x512xf32>
    %3 = math.absf %2 : vector<8x512xf32>
    %c32_i32 = arith.constant 32 : i32
    %4 = tpu.dynamic_rotate %0 by %c32_i32 dim 1 : vector<8x512xf32>, i32 -> vector<8x512xf32>
    %5 = arith.subf %0, %4 : vector<8x512xf32>
    %6 = math.absf %5 : vector<8x512xf32>
    %c0_3 = arith.constant 0 : index
    %c0_4 = arith.constant 0 : index
    %7 = vector.load %arg3[%c0_3, %c0_4] : memref<1x512xf32, #tpu.memory_space<vmem>>, vector<1x512xf32>
    %8 = vector.broadcast %7 : vector<1x512xf32> to vector<8x512xf32>
    %9 = arith.mulf %6, %8 : vector<8x512xf32>
    %10 = vector.shape_cast %3 : vector<8x512xf32> to vector<1x8x512xf32>
    %cst = arith.constant dense<0.000000e+00> : vector<1xf32>
    %11 = vector.multi_reduction <add>, %10, %cst [1, 2] : vector<1x8x512xf32> to vector<1xf32>
    %12 = vector.shape_cast %11 : vector<1xf32> to vector<1x1x1xf32>
    %13 = vector.extract %12[0, 0, 0] : f32 from vector<1x1x1xf32>
    %14 = vector.shape_cast %9 : vector<8x512xf32> to vector<1x8x512xf32>
    %cst_5 = arith.constant dense<0.000000e+00> : vector<1xf32>
    %15 = vector.multi_reduction <add>, %14, %cst_5 [1, 2] : vector<1x8x512xf32> to vector<1xf32>
    %16 = vector.shape_cast %15 : vector<1xf32> to vector<1x1x1xf32>
    %17 = vector.extract %16[0, 0, 0] : f32 from vector<1x1x1xf32>
    %18 = vector.broadcast %13 : f32 to vector<8x128xf32>
    %c0_6 = arith.constant 0 : index
    %c0_7 = arith.constant 0 : index
    %19 = vector.load %arg4[%c0_6, %c0_7] : memref<8x128xf32, #tpu.memory_space<vmem>>, vector<8x128xf32>
    tpu.vector_store %arg4[%c0_6, %c0_7], %18 {strides = array<i32>} : memref<8x128xf32, #tpu.memory_space<vmem>>, vector<8x128xf32>,
    %20 = vector.broadcast %17 : f32 to vector<8x128xf32>
    %c0_8 = arith.constant 0 : index
    %c0_9 = arith.constant 0 : index
    %21 = vector.load %arg5[%c0_8, %c0_9] : memref<8x128xf32, #tpu.memory_space<vmem>>, vector<8x128xf32>
    tpu.vector_store %arg5[%c0_8, %c0_9], %20 {strides = array<i32>} : memref<8x128xf32, #tpu.memory_space<vmem>>, vector<8x128xf32>,
    return
  }
  func.func @transform_0(%arg0: i32) -> (i32, i32) {
    %c0_i32 = arith.constant 0 : i32
    %c0_i32_0 = arith.constant 0 : i32
    return %arg0, %c0_i32 : i32, i32
  }
  func.func @transform_1(%arg0: i32) -> (i32, i32) {
    %c0_i32 = arith.constant 0 : i32
    %c0_i32_0 = arith.constant 0 : i32
    return %arg0, %c0_i32 : i32, i32
  }
  func.func @transform_2(%arg0: i32) -> (i32, i32) {
    %c0_i32 = arith.constant 0 : i32
    %c0_i32_0 = arith.constant 0 : i32
    %c0_i32_1 = arith.constant 0 : i32
    return %c0_i32, %c0_i32_0 : i32, i32
  }
  func.func @transform_3(%arg0: i32) -> (i32, i32) {
    %c0_i32 = arith.constant 0 : i32
    %c0_i32_0 = arith.constant 0 : i32
    return %arg0, %c0_i32 : i32, i32
  }
  func.func @transform_4(%arg0: i32) -> (i32, i32) {
    %c0_i32 = arith.constant 0 : i32
    %c0_i32_0 = arith.constant 0 : i32
    return %arg0, %c0_i32 : i32, i32
  }
}

</mosaic_0001>

<bundles_post_ra>
// kernel: tpu_custom_call.1
= control target key start
LH: loop header
LB: loop body
LE: loop exit
PB: predicated region body
PF: predicated region fallthrough
CT: control target
= control target key end

     0   :  { %10 = vsyncpa [#allocation3], 0  ;;  %s355_s0 = inlined_call_operand.hbm [shape: f32[8,512], index: 0, kind: input, shape index: {}]   ;;  %s356_s1 = inlined_call_operand.hbm [shape: f32[8,512], index: 1, kind: input, shape index: {}]   ;;  %s357_s2 = inlined_call_operand.vmem [shape: f32[1,512], index: 2, kind: input, shape index: {}]   ;;  %s358_s3 = inlined_call_operand.hbm [shape: f32[8,128], index: 3, kind: output, shape index: {0}]   ;;  %s359_s4 = inlined_call_operand.hbm [shape: f32[8,128], index: 4, kind: output, shape index: {1}]  }
   0x1   :  { %11 = vsyncpa [#allocation6], 0 }
   0x2   :  { %12 = vsyncpa [#allocation4], 0 }
   0x3   :  { %13 = vsyncpa [#allocation9], 0  ;;  %s270_s15 = smov [#allocation2]   ;;  %s271_s17 = smov [#allocation5]  }
   0x4   :  { %s20_s16 = sshll.u32 %s270_s15, 4  ;;  %s30_s18 = sshll.u32 %s271_s17, 4  ;;  %s21_s16 = int_to_ptr.vmem [resolvable:$true] %s20_s16  ;;  %s31_s18 = int_to_ptr.vmem [resolvable:$true] %s30_s18 }
   0x5   :  { %s174_s21 = scalar_lea.hbm %s355_s0, 512 }
   0x6   :  { %p175_p0 = scmp.ne.s32.totalorder %s355_s0, %s174_s21  ;;  %p178_p1 = scmp.lt.u32.totalorder %s174_s21, %s355_s0 }
   0x8   :  { %p180_p2 = pnand %p178_p1, %p175_p0 }
   0xa   :  { %183 = shalt.err (!%p180_p2)
}
   0xb   :  { %s184_s26 = scalar_lea.vmem %s21_s16, 512  ;;  %p189_p4 = scmp.lt.s32.totalorder %s21_s16, %s21_s16 }
   0xc   :  { %p185_p3 = scmp.ne.s32.totalorder %s21_s16, %s184_s26  ;;  %p190_p5 = scmp.lt.s32.totalorder %s184_s26, %s184_s26 }
   0xe   :  { %p191_p6 = por %p190_p5, %p189_p4 }
  0x10   :  { %p192_p7 = pnand %p191_p6, %p185_p3 }
  0x12   :  { %195 = shalt.err (!%p192_p7)
}
  0x13   :  { %23 = dma.hbm_to_vmem [thread:$0]  %s355_s0, 512, %s21_s16, [#allocation3]  }
  0x14   :  { %s196_s5 = scalar_lea.hbm %s356_s1, 512 }
  0x15   :  { %p197_p8 = scmp.ne.s32.totalorder %s356_s1, %s196_s5  ;;  %p200_p9 = scmp.lt.u32.totalorder %s196_s5, %s356_s1 }
  0x17   :  { %p202_p10 = pnand %p200_p9, %p197_p8 }
  0x19   :  { %205 = shalt.err (!%p202_p10)
}
  0x1a   :  { %s206_s10 = scalar_lea.vmem %s31_s18, 512  ;;  %p211_p12 = scmp.lt.s32.totalorder %s31_s18, %s31_s18 }
  0x1b   :  { %p207_p11 = scmp.ne.s32.totalorder %s31_s18, %s206_s10  ;;  %p212_p13 = scmp.lt.s32.totalorder %s206_s10, %s206_s10 }
  0x1d   :  { %p213_p0 = por %p212_p13, %p211_p12 }
  0x1f   :  { %p214_p1 = pnand %p213_p0, %p207_p11 }
  0x21   :  { %217 = shalt.err (!%p214_p1)
}
  0x22   :  { %33 = dma.hbm_to_vmem [thread:$0]  %s356_s1, 512, %s31_s18, [#allocation6]  }
  0x23   :  { %262 = dma.done.wait [#allocation3], 512  }
  0x24   :  { %263 = vsyncadd [#allocation3], 4294966784 }
  0x25   :  { %264 = dma.done.wait [#allocation6], 512  }
  0x26   :  { %265 = vsyncadd [#allocation6], 4294966784  ;;  %v45_v0 = vld [vmem:[#allocation2 + $0x18] sm:$0xff]  ;;  %v42_v1 = vld [vmem:[#allocation2] sm:$0xff]  ;;  %s272_s12 = smov 32   ;;  %v66_v19 = vlaneseq }
  0x27   :  { %64 = vrot.lane.b32.xlu1 %v45_v0, %s272_s12  ;;  %58 = vrot.lane.b32.xlu0 %v42_v1, %s272_s12  ;;  %v44_v2 = vld [vmem:[#allocation2 + $0x10] sm:$0xff]  ;;  %v43_v3 = vld [vmem:[#allocation2 + $0x8] sm:$0xff]  ;;  %v46_v4 = vld [vmem:[#allocation5] sm:$0xff] }
  0x28   :  { %v47_v5 = vld [vmem:[#allocation5 + $0x8] sm:$0xff]  ;;  %v50_v6 = vsub.f32 %v42_v1, %v46_v4  ;;  %v48_v8 = vld [vmem:[#allocation5 + $0x10] sm:$0xff]  ;;  %v49_v12 = vld [vmem:[#allocation5 + $0x18] sm:$0xff]  ;;  %v67_v20 = vand.u32 127, %v66_v19  ;;  %v84_v21 = vshrl.u32 %v66_v19, 7 }
  0x29   :  { %v51_v7 = vsub.f32 %v43_v3, %v47_v5  ;;  %v52_v10 = vsub.f32 %v44_v2, %v48_v8  ;;  %v53_v14 = vsub.f32 %v45_v0, %v49_v12  ;;  %v81_v25 = vld [vmem:[%s357_s2] sm:$0xf]  ;;  %s273_s2 = smov [#allocation7]  }
  0x2a   :  { %v54_v9 = vand.u32 2147483647, %v50_v6  ;;  %vm68_vm0 = vcmp.lt.s32.totalorder %v67_v20, 32  ;;  %v85_v23 = vsub.s32 0, %v84_v21  ;;  %v89_v27 = vsub.s32 1, %v84_v21  ;;  %s141_s14 = sshll.u32 %s273_s2, 4  ;;  %s142_s14 = int_to_ptr.vmem [resolvable:$true] %s141_s14 }
  0x2b   :  { %62 = vrot.lane.b32.xlu1 %v44_v2, %s272_s12  ;;  %60 = vrot.lane.b32.xlu0 %v43_v3, %s272_s12  ;;  %v55_v11 = vand.u32 2147483647, %v51_v7  ;;  %v56_v13 = vand.u32 2147483647, %v52_v10  ;;  %v57_v16 = vand.u32 2147483647, %v53_v14  ;;  %p223_p3 = scmp.lt.s32.totalorder %s142_s14, %s142_s14 }
  0x2c   :  { %v86_v29 = vrot.slane %v81_v25, %v85_v23  ;;  %v93_v31 = vsub.s32 2, %v84_v21  ;;  %v97_v33 = vsub.s32 3, %v84_v21  ;;  %v90_v35 = vrot.slane %v81_v25, %v89_v27  ;;  %s218_s16 = scalar_lea.vmem %s142_s14, 128 }
  0x2d   :  { %v107_v15 = vadd.f32 %v55_v11, %v54_v9  ;;  %p219_p2 = scmp.ne.s32.totalorder %s142_s14, %s218_s16  ;;  %p224_p4 = scmp.lt.s32.totalorder %s218_s16, %s218_s16 }
  0x2e   :  { %v94_v42 = vrot.slane %v81_v25, %v93_v31  ;;  %v98_v48 = vrot.slane %v81_v25, %v97_v33 }
  0x2f   :  { %v108_v17 = vadd.f32 %v107_v15, %v56_v13  ;;  %p225_p5 = por %p224_p4, %p223_p3 }
  0x31   :  { %v109_v18 = vadd.f32 %v108_v17, %v57_v16  ;;  %p226_p6 = pnand %p225_p5, %p219_p2 }
  0x4a   :  { %110 = vadd.xlane.f32.xlu0 %v109_v18 }
  0x99   :  { %v65_v22 = vpop.permute.xlu1 %64  ;;  %v59_v24 = vpop.permute.xlu0 %58 }
  0x9a   :  { %v72_v26 = vsel %vm68_vm0, %v65_v22, %v59_v24 }
  0x9b   :  { %v73_v28 = vsub.f32 %v42_v1, %v72_v26 }
  0x9d   :  { %v63_v30 = vpop.permute.xlu1 %62  ;;  %v61_v32 = vpop.permute.xlu0 %60  ;;  %v77_v38 = vand.u32 2147483647, %v73_v28 }
  0x9e   :  { %v69_v34 = vsel %vm68_vm0, %v63_v30, %v65_v22  ;;  %v70_v36 = vsel %vm68_vm0, %v61_v32, %v63_v30  ;;  %v71_v37 = vsel %vm68_vm0, %v59_v24, %v61_v32 }
  0x9f   :  { %v76_v39 = vsub.f32 %v45_v0, %v69_v34  ;;  %v74_v40 = vsub.f32 %v43_v3, %v71_v37  ;;  %v75_v41 = vsub.f32 %v44_v2, %v70_v36  ;;  %v103_v45 = vmul.f32 %v86_v29, %v77_v38 }
  0xa1   :  { %v78_v43 = vand.u32 2147483647, %v74_v40  ;;  %v79_v44 = vand.u32 2147483647, %v75_v41  ;;  %v80_v46 = vand.u32 2147483647, %v76_v39 }
  0xa3   :  { %v104_v47 = vmul.f32 %v90_v35, %v78_v43  ;;  %v105_v49 = vmul.f32 %v94_v42, %v79_v44  ;;  %v106_v51 = vmul.f32 %v98_v48, %v80_v46 }
  0xa5   :  { %v119_v50 = vadd.f32 %v104_v47, %v103_v45 }
  0xa7   :  { %v120_v52 = vadd.f32 %v119_v50, %v105_v49 }
  0xa9   :  { %v121_v53 = vadd.f32 %v120_v52, %v106_v51 }
  0xab   :  { %122 = vadd.xlane.f32.xlu1 %v121_v53 }
  0xd7   :  { %v111_v54 = vpop.xlane.xlu0 %110 }
  0xd8   :  { %v112_v55 = vrot.slane %v111_v54, 4 }
  0xda   :  { %v113_v56 = vadd.f32 %v112_v55, %v111_v54 }
  0xdc   :  { %v114_v57 = vrot.slane %v113_v56, 2 }
  0xde   :  { %v115_v58 = vadd.f32 %v114_v57, %v113_v56 }
  0xe0   :  { %v116_v59 = vrot.slane %v115_v58, 1 }
  0xe2   :  { %v117_v60 = vadd.f32 %v116_v59, %v115_v58 }
  0xe4   :  { %165 = vpush %v117_v60 }
 0x115   :  { %s166_s15 = spop %165 }
 0x116   :  { %v131_v61 = vstv %s166_s15 }
 0x117   :  { %132 = vst [vmem:[#allocation7] sm:$0xff] %v131_v61 }
 0x118   :  { %229 = shalt.err (!%p226_p6)
}
 0x119   :  { %s230_s19 = scalar_lea.hbm %s358_s3, 128 }
 0x11a   :  { %p231_p7 = scmp.ne.s32.totalorder %s358_s3, %s230_s19  ;;  %p234_p8 = scmp.lt.u32.totalorder %s230_s19, %s358_s3 }
 0x11c   :  { %p236_p9 = pnand %p234_p8, %p231_p7 }
 0x11e   :  { %239 = shalt.err (!%p236_p9)
}
 0x11f   :  { %144 = dma.vmem_to_hbm [thread:$0]  %s142_s14, 128, %s358_s3, [#allocation4]  }
 0x120   :  { %s274_s26 = smov [#allocation8]  }
 0x121   :  { %s151_s27 = sshll.u32 %s274_s26, 4  ;;  %s152_s27 = int_to_ptr.vmem [resolvable:$true] %s151_s27 }
 0x122   :  { %s240_s29 = scalar_lea.vmem %s152_s27, 128  ;;  %p245_p11 = scmp.lt.s32.totalorder %s152_s27, %s152_s27 }
 0x123   :  { %p241_p10 = scmp.ne.s32.totalorder %s152_s27, %s240_s29  ;;  %p246_p12 = scmp.lt.s32.totalorder %s240_s29, %s240_s29 }
 0x125   :  { %p247_p13 = por %p246_p12, %p245_p11 }
 0x127   :  { %p248_p0 = pnand %p247_p13, %p241_p10 }
 0x138   :  { %v123_v62 = vpop.xlane.xlu1 %122 }
 0x139   :  { %v124_v63 = vrot.slane %v123_v62, 4 }
 0x13b   :  { %v125_v0 = vadd.f32 %v124_v63, %v123_v62 }
 0x13d   :  { %v126_v1 = vrot.slane %v125_v0, 2 }
 0x13f   :  { %v127_v2 = vadd.f32 %v126_v1, %v125_v0 }
 0x141   :  { %v128_v3 = vrot.slane %v127_v2, 1 }
 0x143   :  { %v129_v4 = vadd.f32 %v128_v3, %v127_v2 }
 0x145   :  { %167 = vpush %v129_v4 }
 0x176   :  { %s168_s28 = spop %167 }
 0x177   :  { %v133_v5 = vstv %s168_s28 }
 0x178   :  { %134 = vst [vmem:[#allocation8] sm:$0xff] %v133_v5 }
 0x179   :  { %251 = shalt.err (!%p248_p0)
}
 0x17a   :  { %s252_s5 = scalar_lea.hbm %s359_s4, 128 }
 0x17b   :  { %p253_p1 = scmp.ne.s32.totalorder %s359_s4, %s252_s5  ;;  %p256_p2 = scmp.lt.u32.totalorder %s252_s5, %s359_s4 }
 0x17d   :  { %p258_p3 = pnand %p256_p2, %p253_p1 }
 0x17f   :  { %261 = shalt.err (!%p258_p3)
}
 0x180   :  { %154 = dma.vmem_to_hbm [thread:$0]  %s152_s27, 128, %s359_s4, [#allocation9]  }
 0x181   :  { %266 = dma.done.wait [#allocation4], 128  }
 0x182   :  { %267 = vsyncadd [#allocation4], 4294967168 }
 0x183   :  { %268 = dma.done.wait [#allocation9], 128  }
 0x184   :  { %269 = vsyncadd [#allocation9], 4294967168 }
 0x185   :  { %161 = vsyncpa [#allocation3], 1 }
 0x186   :  { %162 = vsyncpa [#allocation6], 1 }
 0x187   :  { %163 = vsyncpa [#allocation4], 1 }
 0x188   :  { %164 = vsyncpa [#allocation9], 1 }

</bundles_post_ra>
